<compile_context>
chip_gen: v7x
topology: tpu7x:2x2x1
jax: 0.10.0
libtpu: 0.0.40
codegen_flags: <defaults>
</compile_context>

<pallas_src>
import jax
import jax.numpy as jnp
from jax.experimental import pallas as pl
from jax.experimental.pallas import tpu as pltpu

_MiB = 1024 * 1024


def _round_up(v, k):
    return -(-v // k) * k


def _tpu_vmem_info():
    """Returns (vmem_limit_bytes, multi_core) for the attached TPU generation."""
    cap = None
    try:
        cap = int(pltpu.get_tpu_info().vmem_capacity_bytes)
    except Exception:
        cap = None
    kind = ""
    try:
        kind = jax.devices()[0].device_kind.lower()
    except Exception:
        pass

    is_v7 = ("v7" in kind) or (cap is not None and cap <= 64 * _MiB)
    if is_v7:
        # v7x: only 64 MiB physical VMEM per TensorCore -- leave headroom.
        limit = 44 * _MiB
    elif (cap is not None and cap >= 128 * _MiB) or any(
        g in kind for g in ("v4", "v5", "v6")
    ):
        # v5e / v6e class: 128 MiB physical VMEM; scoped default is too small.
        limit = 64 * _MiB
    else:
        # Unknown device: stay conservative (matches previously verified run).
        limit = 32 * _MiB
    return limit, is_v7


def _pick_tile_m(m, c, oc, itemsize, vmem_limit_bytes, multi_core, batch,
                 weight_buffers=1):
    """Largest lane-axis tile whose pipelined buffers fit the VMEM budget."""
    if m <= 128:
        return m  # full-extent block: always layout-legal

    sub = 8 if itemsize >= 4 else 16  # sublane packing granularity (f32 / bf16)
    # Resident weight: OC on sublanes, C on lanes.
    weight_bytes = (
        _round_up(oc, sub) * _round_up(c, 128) * itemsize * weight_buffers
    )
    # Double-buffered activation + output tiles, bytes per output column.
    per_col = itemsize * (_round_up(c, sub) + _round_up(oc, sub)) * 2
    avail = vmem_limit_bytes - weight_bytes - 2 * _MiB  # headroom for scratch
    cap_cols = max(128, (avail // per_col) // 128 * 128)

    if m % 128 == 0:
        tile_m = min(m, cap_cols)
    else:
        # Keep a 128-multiple tile; the cdiv grid masks the ragged edge tile
        # (columns are independent, so this is safe).
        tile_m = min((m // 128) * 128, cap_cols)

    if multi_core:
        # Make sure both TensorCores get work: batch * n_m_tiles >= 4.
        want_m_tiles = max(1, -(-4 // max(1, batch)))
        if want_m_tiles > 1 and m >= 128 * want_m_tiles:
            cand = max(128, ((m // want_m_tiles) // 128) * 128)
            tile_m = min(tile_m, cand)

    return max(128, tile_m)


def _pointwise_conv_kernel(x_ref, w_ref, o_ref):
    # x_ref: (C, TM) activation tile (M on lanes); w_ref: (OC, C) resident
    # weight; o_ref: (OC, TM) output tile.  One MXU matmul per grid step,
    # f32 accumulation regardless of the I/O dtype.
    o_ref[...] = jnp.dot(
        w_ref[...], x_ref[...], preferred_element_type=jnp.float32
    ).astype(o_ref.dtype)


def _build_pointwise_call(b, c, oc, m, tile_m, dtype, vmem_limit_bytes,
                          single_buffer_weight):
    weight_kwargs = {}
    if single_buffer_weight:
        # Constant index_map -> second pipeline buffer would be dead VMEM.
        weight_kwargs["pipeline_mode"] = pl.Buffered(1)

    itemsize = jnp.dtype(dtype).itemsize
    cost = pl.CostEstimate(
        flops=2 * b * m * c * oc,
        transcendentals=0,
        bytes_accessed=itemsize * (b * m * c + c * oc + b * m * oc),
    )

    return pl.pallas_call(
        _pointwise_conv_kernel,
        out_shape=jax.ShapeDtypeStruct((b, oc, m), dtype),
        grid_spec=pltpu.PrefetchScalarGridSpec(
            num_scalar_prefetch=0,
            grid=(b, pl.cdiv(m, tile_m)),
            in_specs=[
                # Activation: batch dim squeezed, (C, tile_m) per step,
                # M (multiple of 128) on the lane axis.
                pl.BlockSpec((pl.Squeezed(), c, tile_m),
                             lambda bi, mi: (bi, 0, mi)),
                # Weight: constant block index -> fetched once, stays resident.
                pl.BlockSpec((oc, c), lambda bi, mi: (0, 0), **weight_kwargs),
            ],
            out_specs=pl.BlockSpec((pl.Squeezed(), oc, tile_m),
                                   lambda bi, mi: (bi, 0, mi)),
        ),
        compiler_params=pltpu.CompilerParams(
            dimension_semantics=("parallel", "parallel"),
            vmem_limit_bytes=vmem_limit_bytes,
        ),
        cost_estimate=cost,
    )


def pointwise_conv3d_1x1(x, weight):
    """1x1x1 Conv3d, no bias.

    x: (b, c, t, h, w), weight: (oc, c) -> (b, oc, t, h, w), dtype follows x
    (f32 or bf16 I/O; accumulation is always f32).
    """
    b, c, t, h, w = x.shape
    oc = weight.shape[0]
    m = t * h * w
    dtype = x.dtype
    weight = weight.astype(dtype)
    x3 = x.reshape(b, c, m)  # already the (C, M) slab per batch -- no transpose

    vmem_limit, multi_core = _tpu_vmem_info()
    itemsize = jnp.dtype(dtype).itemsize

    try:
        # Preferred path: single-buffered resident weight.
        tile_m = _pick_tile_m(m, c, oc, itemsize, vmem_limit, multi_core, b,
                              weight_buffers=1)
        out3 = _build_pointwise_call(b, c, oc, m, tile_m, dtype, vmem_limit,
                                     single_buffer_weight=True)(x3, weight)
    except Exception:
        # Fallback for jax versions without BlockSpec(pipeline_mode=...):
        # same kernel, weight double-buffered (accounted for in the budget).
        tile_m = _pick_tile_m(m, c, oc, itemsize, vmem_limit, multi_core, b,
                              weight_buffers=2)
        out3 = _build_pointwise_call(b, c, oc, m, tile_m, dtype, vmem_limit,
                                     single_buffer_weight=False)(x3, weight)

    return out3.reshape(b, oc, t, h, w)


class APMPallas:
    """Pallas re-implementation of APM.forward (semantic_mapping only)."""

    def __init__(self, in_channels, out_channels, time_dim=3, temperature=4,
                 contrastive_att=True, *, key=None):
        self.time_dim = time_dim
        self.temperature = temperature
        self.contrastive_att = contrastive_att

        if key is None:
            key = jax.random.PRNGKey(0)
        k_sem, k_x, k_n, k_att = jax.random.split(key, 4)

        # Conv3d(in, out, kernel_size=1, bias=False) weight, stored as (OC, C)
        # so the kernel computes W @ X with M on lanes.
        scale = 1.0 / jnp.sqrt(jnp.float32(in_channels))
        self.semantic_weight = (
            jax.random.normal(k_sem, (out_channels, in_channels), jnp.float32) * scale
        )
        if self.contrastive_att:
            # Initialized for parity with __init__, unused by forward().
            self.x_weight = (
                jax.random.normal(k_x, (out_channels, in_channels), jnp.float32) * scale
            )
            self.n_weight = (
                jax.random.normal(k_n, (out_channels, in_channels), jnp.float32) * scale
            )
            self.att_weight = (
                jax.random.normal(k_att, (1, out_channels), jnp.float32)
                / jnp.sqrt(jnp.float32(out_channels))
            )

    def __call__(self, x):
        # x: (b, c, t, h, w) NCTHW, same as PyTorch.
        # The reference forward computes neighbor_time_index but never uses it
        # (dead code) and returns semantic_mapping(x) only.
        return pointwise_conv3d_1x1(x, self.semantic_weight)


if __name__ == "__main__":
    key = jax.random.PRNGKey(0)
    k_in, k_param = jax.random.split(key)

    b, c, t, h, w = 2, 4, 8, 16, 16   # small NCTHW input
    out_channels = 8

    x = jax.random.normal(k_in, (b, c, t, h, w), jnp.float32)

    apm = APMPallas(in_channels=c, out_channels=out_channels, time_dim=3,
                    key=k_param)

    # f32 path (matches the PyTorch reference numerics).
    semantic = jax.block_until_ready(apm(x))
    ref = jnp.einsum("bcthw,oc->bothw", x, apm.semantic_weight)
    assert semantic.shape == (b, out_channels, t, h, w), semantic.shape
    assert jnp.allclose(semantic, ref, atol=1e-5, rtol=1e-5)

    # Optional bf16 I/O path (same kernel; f32 accumulation, half the HBM bytes).
    x_bf16 = x.astype(jnp.bfloat16)
    semantic_bf16 = jax.block_until_ready(apm(x_bf16))
    ref_bf16 = jnp.einsum(
        "bcthw,oc->bothw",
        x_bf16.astype(jnp.float32),
        apm.semantic_weight.astype(jnp.bfloat16).astype(jnp.float32),
    )
    assert semantic_bf16.dtype == jnp.bfloat16
    assert jnp.allclose(semantic_bf16.astype(jnp.float32), ref_bf16,
                        atol=5e-2, rtol=5e-2)

    print("KERNEL_OK")
</pallas_src>

<mosaic_0001>
module attributes {stable_mosaic.version = 11 : i64} {
  func.func @_pointwise_conv_kernel(%arg0: i32, %arg1: i32, %arg2: memref<1x4x2048xf32, #tpu.memory_space<vmem>>, %arg3: memref<8x4xf32, #tpu.memory_space<vmem>>, %arg4: memref<1x8x2048xf32, #tpu.memory_space<vmem>>) attributes {dimension_semantics = [#tpu.dimension_semantics<parallel>, #tpu.dimension_semantics<parallel>], iteration_bounds = array<i64: 2, 1>, scalar_prefetch = 0 : i64, scratch_operands = 0 : i64, tpu.core_type = #tpu.core_type<tc>, window_params = [{transform_indices = @transform_0, window_bounds = array<i64: 1, 4, 2048>}, {pipeline_mode = #tpu.pipeline_mode<synchronous>, transform_indices = @transform_1, window_bounds = array<i64: 8, 4>}, {transform_indices = @transform_2, window_bounds = array<i64: 1, 8, 2048>}]} {
    %c0 = arith.constant 0 : index
    %c0_0 = arith.constant 0 : index
    %0 = vector.load %arg3[%c0, %c0_0] : memref<8x4xf32, #tpu.memory_space<vmem>>, vector<8x4xf32>
    %c0_1 = arith.constant 0 : index
    %c0_2 = arith.constant 0 : index
    %c0_3 = arith.constant 0 : index
    %1 = vector.load %arg2[%c0_1, %c0_2, %c0_3] : memref<1x4x2048xf32, #tpu.memory_space<vmem>>, vector<1x4x2048xf32>
    %2 = vector.shape_cast %1 : vector<1x4x2048xf32> to vector<4x2048xf32>
    %cst = arith.constant dense<0.000000e+00> : vector<8x2048xf32>
    %3 = tpu.matmul %0, %2, %cst {dimension_numbers = #tpu.dot_dimension_numbers<[1], [0], [0], [1], [0, 0, 1, 1], [], []>} : vector<8x4xf32>, vector<4x2048xf32>, vector<8x2048xf32> -> vector<8x2048xf32>
    %c0_4 = arith.constant 0 : index
    %c0_5 = arith.constant 0 : index
    %c0_6 = arith.constant 0 : index
    %4 = vector.load %arg4[%c0_4, %c0_5, %c0_6] : memref<1x8x2048xf32, #tpu.memory_space<vmem>>, vector<1x8x2048xf32>
    %5 = vector.shape_cast %4 : vector<1x8x2048xf32> to vector<8x2048xf32>
    %6 = vector.shape_cast %3 : vector<8x2048xf32> to vector<1x8x2048xf32>
    tpu.vector_store %arg4[%c0_4, %c0_5, %c0_6], %6 {strides = array<i32>} : memref<1x8x2048xf32, #tpu.memory_space<vmem>>, vector<1x8x2048xf32>,
    return
  }
  func.func @transform_0(%arg0: i32, %arg1: i32) -> (i32, i32, i32) {
    %c0_i32 = arith.constant 0 : i32
    %c0_i32_0 = arith.constant 0 : i32
    return %arg0, %c0_i32, %arg1 : i32, i32, i32
  }
  func.func @transform_1(%arg0: i32, %arg1: i32) -> (i32, i32) {
    %c0_i32 = arith.constant 0 : i32
    %c0_i32_0 = arith.constant 0 : i32
    %c0_i32_1 = arith.constant 0 : i32
    return %c0_i32, %c0_i32_0 : i32, i32
  }
  func.func @transform_2(%arg0: i32, %arg1: i32) -> (i32, i32, i32) {
    %c0_i32 = arith.constant 0 : i32
    %c0_i32_0 = arith.constant 0 : i32
    return %arg0, %c0_i32, %arg1 : i32, i32, i32
  }
}

module attributes {stable_mosaic.version = 11 : i64} {
  func.func @_pointwise_conv_kernel(%arg0: i32, %arg1: i32, %arg2: memref<1x4x2048xf32, #tpu.memory_space<vmem>>, %arg3: memref<8x4xf32, #tpu.memory_space<vmem>>, %arg4: memref<1x8x2048xf32, #tpu.memory_space<vmem>>) attributes {dimension_semantics = [#tpu.dimension_semantics<parallel>, #tpu.dimension_semantics<parallel>], iteration_bounds = array<i64: 2, 1>, scalar_prefetch = 0 : i64, scratch_operands = 0 : i64, tpu.core_type = #tpu.core_type<tc>, window_params = [{transform_indices = @transform_0, window_bounds = array<i64: 1, 4, 2048>}, {pipeline_mode = #tpu.pipeline_mode<synchronous>, transform_indices = @transform_1, window_bounds = array<i64: 8, 4>}, {transform_indices = @transform_2, window_bounds = array<i64: 1, 8, 2048>}]} {
    %c0 = arith.constant 0 : index
    %c0_0 = arith.constant 0 : index
    %0 = vector.load %arg3[%c0, %c0_0] : memref<8x4xf32, #tpu.memory_space<vmem>>, vector<8x4xf32>
    %c0_1 = arith.constant 0 : index
    %c0_2 = arith.constant 0 : index
    %c0_3 = arith.constant 0 : index
    %1 = vector.load %arg2[%c0_1, %c0_2, %c0_3] : memref<1x4x2048xf32, #tpu.memory_space<vmem>>, vector<1x4x2048xf32>
    %2 = vector.shape_cast %1 : vector<1x4x2048xf32> to vector<4x2048xf32>
    %cst = arith.constant dense<0.000000e+00> : vector<8x2048xf32>
    %3 = tpu.matmul %0, %2, %cst {dimension_numbers = #tpu.dot_dimension_numbers<[1], [0], [0], [1], [0, 0, 1, 1], [], []>} : vector<8x4xf32>, vector<4x2048xf32>, vector<8x2048xf32> -> vector<8x2048xf32>
    %c0_4 = arith.constant 0 : index
    %c0_5 = arith.constant 0 : index
    %c0_6 = arith.constant 0 : index
    %4 = vector.load %arg4[%c0_4, %c0_5, %c0_6] : memref<1x8x2048xf32, #tpu.memory_space<vmem>>, vector<1x8x2048xf32>
    %5 = vector.shape_cast %4 : vector<1x8x2048xf32> to vector<8x2048xf32>
    %6 = vector.shape_cast %3 : vector<8x2048xf32> to vector<1x8x2048xf32>
    tpu.vector_store %arg4[%c0_4, %c0_5, %c0_6], %6 {strides = array<i32>} : memref<1x8x2048xf32, #tpu.memory_space<vmem>>, vector<1x8x2048xf32>,
    return
  }
  func.func @transform_0(%arg0: i32, %arg1: i32) -> (i32, i32, i32) {
    %c0_i32 = arith.constant 0 : i32
    %c0_i32_0 = arith.constant 0 : i32
    return %arg0, %c0_i32, %arg1 : i32, i32, i32
  }
  func.func @transform_1(%arg0: i32, %arg1: i32) -> (i32, i32) {
    %c0_i32 = arith.constant 0 : i32
    %c0_i32_0 = arith.constant 0 : i32
    %c0_i32_1 = arith.constant 0 : i32
    return %c0_i32, %c0_i32_0 : i32, i32
  }
  func.func @transform_2(%arg0: i32, %arg1: i32) -> (i32, i32, i32) {
    %c0_i32 = arith.constant 0 : i32
    %c0_i32_0 = arith.constant 0 : i32
    return %arg0, %c0_i32, %arg1 : i32, i32, i32
  }
}

</mosaic_0001>

<bundles_post_ra>
// kernel: tpu_custom_call.1
= control target key start
LH: loop header
LB: loop body
LE: loop exit
PB: predicated region body
PF: predicated region fallthrough
CT: control target
= control target key end

     0   :  { %7 = vsyncpa [#allocation3], 0  ;;  %s1400_s0 = inlined_call_operand.hbm [shape: f32[2,4,2048], index: 0, kind: input, shape index: {}]   ;;  %s1401_s1 = inlined_call_operand.vmem [shape: f32[8,4], index: 1, kind: input, shape index: {}]   ;;  %s1402_s2 = inlined_call_operand.hbm [shape: f32[2,8,2048], index: 2, kind: output, shape index: {}]  }
   0x1   :  { %9 = vsyncpa [#allocation3 + $0x1], 0 }
   0x2   :  { %10 = vsyncpa [#allocation4], 0 }
   0x3   :  { %12 = vsyncpa [#allocation4 + $0x1], 0  ;;  %s1171_s9 = smov 0   ;;  %s1173_s10 = smov 0  }
   0x4   :  { %s1175_s11 = smov 0   ;;  %s1177_s12 = smov 0  }
   0x5   :  { %s1179_s13 = smov 0   ;;  %s1181_s14 = smov 0  }
   0x6 LB: > { %s927_s15 = sadd.s32 4294967295, %s1151_s14   ;;  %s928_s16 = sadd.s32 4294967294, %s1151_s14   ;;  %s1151_s14 = sphi %s1181_s14, %s18_s14   ;;  %s1147_s13 = sphi %s1179_s13, %s1418_s13   ;;  %s1143_s12 = sphi %s1177_s12, %s1417_s12   ;;  %s1139_s11 = sphi %s1175_s11, %s1416_s11   ;;  %s1135_s10 = sphi %s1173_s10, %s1415_s10   ;;  %s1131_s9 = sphi %s1171_s9, %s1414_s9  }
   0x7   : > { %s30_s17 = sadd.s32 1, %s1147_s13  ;;  %s39_s18 = sadd.s32 1, %s1139_s11 }
   0x8   : > { %p32_p0 = scmp.ge.s32.totalorder %s30_s17, 2  ;;  %p46_p1 = scmp.ne.s32.totalorder %s1139_s11, %s1135_s10 }
   0x9   : > { %p47_p2 = scmp.eq.s32.totalorder %s1151_s14, 0  ;;  %p52_p3 = scmp.ne.s32.totalorder %s1135_s10, %s1131_s9 }
   0xa   : > { %s1420_s17 = smov (%p32_p0, %s30_s17), 0  ;;  %p53_p5 = scmp.eq.s32.totalorder %s927_s15, 0 }
   0xb   : > { %p1212_p4 = por %p47_p2, %p46_p1  ;;  %s34_s20 = ssub.s32 %s1147_s13, %s1420_s17 }
   0xc   : > { %p99_p6 = scmp.eq.s32.totalorder %s927_s15, 1  ;;  %p37_p7 = scmp.eq.s32.totalorder %s34_s20, 0 }
   0xd   : > { %p1218_p8 = por %p53_p5, %p52_p3  ;;  %p105_p10 = scmp.eq.s32.totalorder %s928_s16, 1 }
   0xe   : > { %p1222_p9 = por %p99_p6, %p46_p1  ;;  %p980_p13 = scmp.lt.s32.totalorder %s1151_s14, 2 }
   0xf   : > { %s1227_s23 = scalar_select %p37_p7, %s1139_s11, %s39_s18  }
  0x10   : > { %s1406_s22 = scalar_select %p1222_p9, 1, 0 }
  0x11   : > { %p1229_p11 = por %p105_p10, %p52_p3  ;;  %s128_s25 = sand.u32 1, %s1139_s11  }
  0x12   : > { %s931_s26 = sshll.u32 %s128_s25, 6  ;;  %s966_s27 = sshll.u32 %s1147_s13, 10 }
  0x13   : > { %s1407_s24 = scalar_select %p1229_p11, 1, 0 }
  0x14   : > { %s1240_s30 = scalar_lea.hbm %s1400_s0, %s966_s27  ;;  %s132_s3 = scalar_lea.vmem [#allocation2], %s931_s26 }
  0x15   : > { %s142_s4 = sshll.u32 %s132_s3, 4  ;;  %p1246_p0 = pnand %p980_p13, %p1212_p4  ;;  %s1242_s4 = int_to_ptr.vmem [resolvable:$true] %s142_s4 }
  0x16   : > { %s129_s6 = scalar_lea.sflag [#allocation3], %s128_s25  ;;  %s1039_s7 = scalar_lea.hbm %s1240_s30, 1024 }
  0x17   : > { %p1040_p3 = scmp.ne.s32.totalorder %s1240_s30, %s1039_s7  ;;  %p1041_p5 = pneg %p1246_p0 }
  0x18   : > { %s1044_s16 = scalar_lea.hbm %s1400_s0, 2048  ;;  %p1045_p4 = scmp.lt.u32.totalorder %s1240_s30, %s1400_s0 }
  0x19   : > { %p1042_p6 = pnand %p1041_p5, %p1040_p3  ;;  %p1046_p10 = scmp.lt.u32.totalorder %s1044_s16, %s1039_s7 }
  0x1a   : > { %p1048_p12 = scmp.lt.u32.totalorder %s1039_s7, %s1240_s30 }
  0x1b   : > { %p1043_p7 = pneg %p1042_p6  ;;  %p1047_p13 = por %p1046_p10, %p1045_p4 }
  0x1d   : > { %p1049_p1 = por %p1048_p12, %p1047_p13 }
  0x1f   : > { %p1050_p2 = pnand %p1049_p1, %p1043_p7 }
  0x21   : > { %1053 = shalt.err (!%p1050_p2)
}
  0x22   : > { %s1054_s20 = scalar_lea.vmem %s1242_s4, 1024  ;;  %s1153_s25 = smov [#allocation2]  }
  0x23   : > { %p1055_p3 = scmp.ne.s32.totalorder %s1242_s4, %s1054_s20  ;;  %s1059_s26 = sshll.u32 %s1153_s25, 4  ;;  %s1060_s26 = int_to_ptr.vmem [resolvable:$false] %s1059_s26 }
  0x24   : > { %s1061_s27 = scalar_lea.vmem %s1060_s26, 2048  ;;  %p1062_p9 = scmp.lt.s32.totalorder %s1242_s4, %s1060_s26 }
  0x25   : > { %p1057_p6 = pnand %p1055_p3, %p1041_p5  ;;  %p1063_p4 = scmp.lt.s32.totalorder %s1061_s27, %s1054_s20 }
  0x27   : > { %p1058_p11 = pneg %p1057_p6  ;;  %p1064_p10 = por %p1063_p4, %p1062_p9 }
  0x29   : > { %p1065_p12 = pnand %p1064_p10, %p1058_p11 }
  0x2b   : > { %1068 = shalt.err (!%p1065_p12)
}
  0x2c   : > { %975 = dma.hbm_to_vmem [thread:$0]  (!%p1246_p0), %s1240_s30, 1024, %s1242_s4, %s129_s6  }
  0x2d   : > { %p1409_p1 = scmp.lt.s32.totalorder %s1151_s14, 3  ;;  %p1410_p2 = scmp.ge.s32.totalorder %s1151_s14, 1 }
  0x2f   : > { %p148_p5 = pnand %p1410_p2, %p1409_p1 }
  0x30   : > { %s1282_s28 = sand.u32 (!%p148_p5), 1, %s1135_s10  }
  0x31   : > { %151 = sbr.rel (%p148_p5) target bundleno = 301 (0x12d), region = 28  ;;  %s935_s29 = sshll.u32 (!%p148_p5), %s1282_s28, 6 }
  0x32   : > { %s154_s3 = scalar_lea.sflag (!%p148_p5), [#allocation3], %s1282_s28  ;;  %s1286_s7 = scalar_lea.vmem (!%p148_p5), [#allocation2], %s935_s29 }
  0x38   : > { %1122 = dma.done.wait (%p1218_p8), %s154_s3, 1024  }
  0x39   : > { %1124 = vsyncadd (%p1218_p8), %s154_s3, 4294966272  ;;  %v1154_v0 = vmov 0.0   ;;  %v181_v1 = vld [vmem:[%s1286_s7] sm:$0xff]  ;;  %vm209_vm0 = vcmask 1043456   ;;  %v182_v2 = vld [vmem:[%s1286_s7 + $0x8] sm:$0xff]  ;;  %vm205_vm1 = vcmask 31744  }
  0x3a   : > { %306 = vmatprep.mubr.f32.mxu0 %v1154_v0  ;;  %377 = vmatprep.mubr.f32.mxu1 %v1154_v0  ;;  %v197_v3 = vcombine.high %v181_v1, %v181_v1  ;;  %v198_v4 = vcombine.high %v182_v2, %v182_v2  ;;  %v183_v5 = vld [vmem:[%s1286_s7 + $0x10] sm:$0xff]  ;;  %v184_v6 = vld [vmem:[%s1286_s7 + $0x18] sm:$0xff]  ;;  %v180_v7 = vld [vmem:[%s1401_s1] sm:$0xff]  ;;  %s936_s21 = sshll.u32 %s1282_s28, 7  ;;  %s967_s6 = sshll.u32 %s1143_s12, 11 }
  0x3b   : > { %v199_v8 = vcombine.high %v183_v5, %v183_v5  ;;  %v200_v9 = vcombine.high %v184_v6, %v184_v6  ;;  %v185_v10 = vld [vmem:[%s1286_s7 + $0x20] sm:$0xff]  ;;  %v186_v11 = vld [vmem:[%s1286_s7 + $0x28] sm:$0xff]  ;;  %v187_v14 = vld [vmem:[%s1286_s7 + $0x30] sm:$0xff]  ;;  %s1328_s5 = scalar_lea.vmem [#allocation5], %s936_s21  ;;  %s1347_s18 = scalar_lea.hbm %s1402_s2, %s967_s6 }
  0x3c   : > { %937 = vmatprep.subr.msk.mxu0 %vm209_vm0, %v197_v3  ;;  %940 = vmatprep.subr.msk.mxu1 %vm209_vm0, %v198_v4  ;;  %v201_v12 = vcombine.high %v185_v10, %v185_v10  ;;  %v202_v13 = vcombine.high %v186_v11, %v186_v11  ;;  %v188_v15 = vld [vmem:[%s1286_s7 + $0x38] sm:$0xff]  ;;  %v203_v16 = vcombine.high %v187_v14, %v187_v14  ;;  %s843_s8 = sshll.u32 %s1328_s5, 4  ;;  %s827_s12 = scalar_lea.sflag [#allocation4], %s1282_s28  ;;  %s1349_s8 = int_to_ptr.vmem [resolvable:$true] %s843_s8 }
  0x3d   : > { %938 = vmatpush1.msk.msra.mxu0 %vm209_vm0, %v181_v1  ;;  %941 = vmatpush1.msk.msra.mxu1 %vm209_vm0, %v182_v2  ;;  %v204_v17 = vcombine.high %v188_v15, %v188_v15  ;;  %s1069_s19 = scalar_lea.vmem %s1349_s8, 2048  ;;  %p1411_p9 = scmp.ne.s32.totalorder %s1406_s22, 0 }
  0x3e   : > { %939 = vmatmul.mubr.msk.f32.vlgmr.msra.gmra.mrb[0].mxu0 %vm205_vm1, %v180_v7  ;;  %942 = vmatmul.mubr.msk.f32.vlgmr.msra.gmra.mrb[0].mxu1 %vm205_vm1, %v180_v7  ;;  %p1070_p8 = scmp.ne.s32.totalorder %s1349_s8, %s1069_s19  ;;  %s1155_s20 = smov [#allocation5]  }
  0x3f   : > { %943 = vmatprep.subr.msk.mxu0 %vm209_vm0, %v199_v8  ;;  %946 = vmatprep.subr.msk.mxu1 %vm209_vm0, %v200_v9  ;;  %s1073_s25 = sshll.u32 %s1155_s20, 4  ;;  %s1074_s25 = int_to_ptr.vmem [resolvable:$false] %s1073_s25 }
  0x40   : > { %944 = vmatpush1.msk.msra.mxu0 %vm209_vm0, %v183_v5  ;;  %947 = vmatpush1.msk.msra.mxu1 %vm209_vm0, %v184_v6  ;;  %p1071_p11 = pnand %p1070_p8, %p1411_p9  ;;  %s1075_s26 = scalar_lea.vmem %s1074_s25, 4096 }
  0x41   : > { %448 = vmatprep.mubr.f32.mxu0 %v1154_v0  ;;  %519 = vmatprep.mubr.f32.mxu1 %v1154_v0  ;;  %p1076_p7 = scmp.lt.s32.totalorder %s1349_s8, %s1074_s25  ;;  %p1077_p13 = scmp.lt.s32.totalorder %s1075_s26, %s1069_s19 }
  0x42   : > { %945 = vmatmul.mubr.msk.f32.vlgmr.msra.gmra.mrb[2].mxu0 %vm205_vm1, %v180_v7  ;;  %948 = vmatmul.mubr.msk.f32.vlgmr.msra.gmra.mrb[2].mxu1 %vm205_vm1, %v180_v7  ;;  %p1072_p0 = pneg %p1071_p11 }
  0x43   : > { %949 = vmatprep.subr.msk.mxu0 %vm209_vm0, %v201_v12  ;;  %952 = vmatprep.subr.msk.mxu1 %vm209_vm0, %v202_v13  ;;  %p1078_p3 = por %p1077_p13, %p1076_p7 }
  0x44   : > { %950 = vmatpush1.msk.msra.mxu0 %vm209_vm0, %v185_v10  ;;  %953 = vmatpush1.msk.msra.mxu1 %vm209_vm0, %v186_v11 }
  0x45   : > { %590 = vmatprep.mubr.f32.mxu0 %v1154_v0  ;;  %661 = vmatprep.mubr.f32.mxu1 %v1154_v0  ;;  %p1079_p6 = pnand %p1078_p3, %p1072_p0 }
  0x46   : > { %951 = vmatmul.mubr.msk.f32.vlgmr.msra.gmra.mrb[4].mxu0 %vm205_vm1, %v180_v7  ;;  %954 = vmatmul.mubr.msk.f32.vlgmr.msra.gmra.mrb[4].mxu1 %vm205_vm1, %v180_v7 }
  0x47   : > { %955 = vmatprep.subr.msk.mxu0 %vm209_vm0, %v203_v16  ;;  %958 = vmatprep.subr.msk.mxu1 %vm209_vm0, %v204_v17 }
  0x48   : > { %956 = vmatpush1.msk.msra.mxu0 %vm209_vm0, %v187_v14  ;;  %959 = vmatpush1.msk.msra.mxu1 %vm209_vm0, %v188_v15 }
  0x49   : > { %732 = vmatprep.mubr.f32.mxu0 %v1154_v0  ;;  %803 = vmatprep.mubr.f32.mxu1 %v1154_v0 }
  0x4a   : > { %957 = vmatmul.mubr.msk.f32.vlgmr.msra.gmra.mrb[6].mxu0 %vm205_vm1, %v180_v7  ;;  %960 = vmatmul.mubr.msk.f32.vlgmr.msra.gmra.mrb[6].mxu1 %vm205_vm1, %v180_v7 }
 0x111   : > { %v308_v18 = vpop.f32.mrb[0].mxu0  ;;  %v379_v19 = vpop.f32.mrb[0].mxu1 }
 0x112   : > { %810 = vst [vmem:[%s1328_s5] sm:$0xff] %v308_v18  ;;  %812 = vst [vmem:[%s1328_s5 + $0x10] sm:$0xff] %v379_v19  ;;  %v310_v20 = vpop.f32.mrb[1].mxu0  ;;  %v381_v21 = vpop.f32.mrb[1].mxu1 }
 0x113   : > { %811 = vst [vmem:[%s1328_s5 + $0x8] sm:$0xff] %v310_v20  ;;  %813 = vst [vmem:[%s1328_s5 + $0x18] sm:$0xff] %v381_v21 }
 0x115   : > { %v450_v22 = vpop.f32.mrb[2].mxu0  ;;  %v521_v23 = vpop.f32.mrb[2].mxu1 }
 0x116   : > { %814 = vst [vmem:[%s1328_s5 + $0x20] sm:$0xff] %v450_v22  ;;  %816 = vst [vmem:[%s1328_s5 + $0x30] sm:$0xff] %v521_v23  ;;  %v452_v24 = vpop.f32.mrb[3].mxu0  ;;  %v523_v25 = vpop.f32.mrb[3].mxu1 }
 0x117   : > { %815 = vst [vmem:[%s1328_s5 + $0x28] sm:$0xff] %v452_v24  ;;  %817 = vst [vmem:[%s1328_s5 + $0x38] sm:$0xff] %v523_v25 }
 0x119   : > { %v592_v26 = vpop.f32.mrb[4].mxu0  ;;  %v663_v27 = vpop.f32.mrb[4].mxu1 }
 0x11a   : > { %818 = vst [vmem:[%s1328_s5 + $0x40] sm:$0xff] %v592_v26  ;;  %820 = vst [vmem:[%s1328_s5 + $0x50] sm:$0xff] %v663_v27  ;;  %v594_v28 = vpop.f32.mrb[5].mxu0  ;;  %v665_v29 = vpop.f32.mrb[5].mxu1 }
 0x11b   : > { %819 = vst [vmem:[%s1328_s5 + $0x48] sm:$0xff] %v594_v28  ;;  %821 = vst [vmem:[%s1328_s5 + $0x58] sm:$0xff] %v665_v29 }
 0x11d   : > { %v734_v30 = vpop.f32.mrb[6].mxu0  ;;  %v805_v31 = vpop.f32.mrb[6].mxu1 }
 0x11e   : > { %822 = vst [vmem:[%s1328_s5 + $0x60] sm:$0xff] %v734_v30  ;;  %824 = vst [vmem:[%s1328_s5 + $0x70] sm:$0xff] %v805_v31  ;;  %v736_v32 = vpop.f32.mrb[7].mxu0  ;;  %v807_v33 = vpop.f32.mrb[7].mxu1 }
 0x11f   : > { %823 = vst [vmem:[%s1328_s5 + $0x68] sm:$0xff] %v736_v32  ;;  %825 = vst [vmem:[%s1328_s5 + $0x78] sm:$0xff] %v807_v33 }
 0x120   : > { %1082 = shalt.err (!%p1079_p6)
}
 0x121   : > { %s1083_s27 = scalar_lea.hbm %s1347_s18, 2048  ;;  %s1087_s3 = scalar_lea.hbm %s1402_s2, 4096 }
 0x122   : > { %p1084_p4 = scmp.ne.s32.totalorder %s1347_s18, %s1083_s27  ;;  %p1088_p1 = scmp.lt.u32.totalorder %s1347_s18, %s1402_s2 }
 0x123   : > { %p1089_p2 = scmp.lt.u32.totalorder %s1087_s3, %s1083_s27  ;;  %p1091_p8 = scmp.lt.u32.totalorder %s1083_s27, %s1347_s18 }
 0x124   : > { %p1085_p10 = pnand %p1084_p4, %p1411_p9 }
 0x125   : > { %p1090_p5 = por %p1089_p2, %p1088_p1 }
 0x126   : > { %p1086_p12 = pneg %p1085_p10 }
 0x127   : > { %p1092_p11 = por %p1091_p8, %p1090_p5 }
 0x129   : > { %p1093_p0 = pnand %p1092_p11, %p1086_p12 }
 0x12b   : > { %1096 = shalt.err (!%p1093_p0)
}
 0x12c   : > { %970 = dma.vmem_to_hbm [thread:$0]  (%p1411_p9), %s1349_s8, 2048, %s1347_s18, %s827_s12  }
 0x12d PF: > { %s855_s4 = sand.u32 1, %s1131_s9   ;;  %p1412_p7 = scmp.ne.s32.totalorder %s1407_s24, 0 }
 0x12e   : > { %p1413_p13 = scmp.ge.s32.totalorder %s1151_s14, 2  ;;  %s856_s21 = scalar_lea.sflag [#allocation4], %s855_s4 }
 0x130   : > { %p977_p3 = pnand %p1413_p13, %p1412_p7 }
 0x132   : > { %1126 = dma.done.wait (!%p977_p3), %s856_s21, 2048  }
 0x133   : > { %1128 = vsyncadd (!%p977_p3), %s856_s21, 4294965248  ;;  %s18_s14 = sadd.s32 1, %s1151_s14   ;;  %s1414_s9 = smov %s1135_s10 }
 0x134   : > { %p15_p6 = scmp.ge.s32.totalorder %s18_s14, 4   ;;  %s1415_s10 = smov %s1139_s11 }
 0x135   : > { %s1416_s11 = smov %s1227_s23  ;;  %s1417_s12 = smov %s1147_s13 }
 0x136   : > { %s1418_s13 = smov %s1420_s17  ;;  %17 = sbr.rel (!%p15_p6) target bundleno = 6 (0x6), region = 73 }
 0x13d   :  { %861 = vsyncpa [#allocation3], 1 }
 0x13e   :  { %863 = vsyncpa [#allocation3 + $0x1], 1 }
 0x13f   :  { %864 = vsyncpa [#allocation4], 1 }
 0x140   :  { %866 = vsyncpa [#allocation4 + $0x1], 1 }

// kernel: tpu_custom_call.1
= control target key start
LH: loop header
LB: loop body
LE: loop exit
PB: predicated region body
PF: predicated region fallthrough
CT: control target
= control target key end

     0   :  { %7 = vsyncpa [#allocation3], 0  ;;  %s1400_s0 = inlined_call_operand.hbm [shape: f32[2,4,2048], index: 0, kind: input, shape index: {}]   ;;  %s1401_s1 = inlined_call_operand.vmem [shape: f32[8,4], index: 1, kind: input, shape index: {}]   ;;  %s1402_s2 = inlined_call_operand.hbm [shape: f32[2,8,2048], index: 2, kind: output, shape index: {}]  }
   0x1   :  { %9 = vsyncpa [#allocation3 + $0x1], 0 }
   0x2   :  { %10 = vsyncpa [#allocation4], 0 }
   0x3   :  { %12 = vsyncpa [#allocation4 + $0x1], 0  ;;  %s1171_s9 = smov 0   ;;  %s1173_s10 = smov 0  }
   0x4   :  { %s1175_s11 = smov 0   ;;  %s1177_s12 = smov 0  }
   0x5   :  { %s1179_s13 = smov 0   ;;  %s1181_s14 = smov 0  }
   0x6 LB: > { %s927_s15 = sadd.s32 4294967295, %s1151_s14   ;;  %s928_s16 = sadd.s32 4294967294, %s1151_s14   ;;  %s1151_s14 = sphi %s1181_s14, %s18_s14   ;;  %s1147_s13 = sphi %s1179_s13, %s1418_s13   ;;  %s1143_s12 = sphi %s1177_s12, %s1417_s12   ;;  %s1139_s11 = sphi %s1175_s11, %s1416_s11   ;;  %s1135_s10 = sphi %s1173_s10, %s1415_s10   ;;  %s1131_s9 = sphi %s1171_s9, %s1414_s9  }
   0x7   : > { %s30_s17 = sadd.s32 1, %s1147_s13  ;;  %s39_s18 = sadd.s32 1, %s1139_s11 }
   0x8   : > { %p32_p0 = scmp.ge.s32.totalorder %s30_s17, 2  ;;  %p46_p1 = scmp.ne.s32.totalorder %s1139_s11, %s1135_s10 }
   0x9   : > { %p47_p2 = scmp.eq.s32.totalorder %s1151_s14, 0  ;;  %p52_p3 = scmp.ne.s32.totalorder %s1135_s10, %s1131_s9 }
   0xa   : > { %s1420_s17 = smov (%p32_p0, %s30_s17), 0  ;;  %p53_p5 = scmp.eq.s32.totalorder %s927_s15, 0 }
   0xb   : > { %p1212_p4 = por %p47_p2, %p46_p1  ;;  %s34_s20 = ssub.s32 %s1147_s13, %s1420_s17 }
   0xc   : > { %p99_p6 = scmp.eq.s32.totalorder %s927_s15, 1  ;;  %p37_p7 = scmp.eq.s32.totalorder %s34_s20, 0 }
   0xd   : > { %p1218_p8 = por %p53_p5, %p52_p3  ;;  %p105_p10 = scmp.eq.s32.totalorder %s928_s16, 1 }
   0xe   : > { %p1222_p9 = por %p99_p6, %p46_p1  ;;  %p980_p13 = scmp.lt.s32.totalorder %s1151_s14, 2 }
   0xf   : > { %s1227_s23 = scalar_select %p37_p7, %s1139_s11, %s39_s18  }
  0x10   : > { %s1406_s22 = scalar_select %p1222_p9, 1, 0 }
  0x11   : > { %p1229_p11 = por %p105_p10, %p52_p3  ;;  %s128_s25 = sand.u32 1, %s1139_s11  }
  0x12   : > { %s931_s26 = sshll.u32 %s128_s25, 6  ;;  %s966_s27 = sshll.u32 %s1147_s13, 10 }
  0x13   : > { %s1407_s24 = scalar_select %p1229_p11, 1, 0 }
  0x14   : > { %s1240_s30 = scalar_lea.hbm %s1400_s0, %s966_s27  ;;  %s132_s3 = scalar_lea.vmem [#allocation2], %s931_s26 }
  0x15   : > { %s142_s4 = sshll.u32 %s132_s3, 4  ;;  %p1246_p0 = pnand %p980_p13, %p1212_p4  ;;  %s1242_s4 = int_to_ptr.vmem [resolvable:$true] %s142_s4 }
  0x16   : > { %s129_s6 = scalar_lea.sflag [#allocation3], %s128_s25  ;;  %s1039_s7 = scalar_lea.hbm %s1240_s30, 1024 }
  0x17   : > { %p1040_p3 = scmp.ne.s32.totalorder %s1240_s30, %s1039_s7  ;;  %p1041_p5 = pneg %p1246_p0 }
  0x18   : > { %s1044_s16 = scalar_lea.hbm %s1400_s0, 2048  ;;  %p1045_p4 = scmp.lt.u32.totalorder %s1240_s30, %s1400_s0 }
  0x19   : > { %p1042_p6 = pnand %p1041_p5, %p1040_p3  ;;  %p1046_p10 = scmp.lt.u32.totalorder %s1044_s16, %s1039_s7 }
  0x1a   : > { %p1048_p12 = scmp.lt.u32.totalorder %s1039_s7, %s1240_s30 }
  0x1b   : > { %p1043_p7 = pneg %p1042_p6  ;;  %p1047_p13 = por %p1046_p10, %p1045_p4 }
  0x1d   : > { %p1049_p1 = por %p1048_p12, %p1047_p13 }
  0x1f   : > { %p1050_p2 = pnand %p1049_p1, %p1043_p7 }
  0x21   : > { %1053 = shalt.err (!%p1050_p2)
}
  0x22   : > { %s1054_s20 = scalar_lea.vmem %s1242_s4, 1024  ;;  %s1153_s25 = smov [#allocation2]  }
  0x23   : > { %p1055_p3 = scmp.ne.s32.totalorder %s1242_s4, %s1054_s20  ;;  %s1059_s26 = sshll.u32 %s1153_s25, 4  ;;  %s1060_s26 = int_to_ptr.vmem [resolvable:$false] %s1059_s26 }
  0x24   : > { %s1061_s27 = scalar_lea.vmem %s1060_s26, 2048  ;;  %p1062_p9 = scmp.lt.s32.totalorder %s1242_s4, %s1060_s26 }
  0x25   : > { %p1057_p6 = pnand %p1055_p3, %p1041_p5  ;;  %p1063_p4 = scmp.lt.s32.totalorder %s1061_s27, %s1054_s20 }
  0x27   : > { %p1058_p11 = pneg %p1057_p6  ;;  %p1064_p10 = por %p1063_p4, %p1062_p9 }
  0x29   : > { %p1065_p12 = pnand %p1064_p10, %p1058_p11 }
  0x2b   : > { %1068 = shalt.err (!%p1065_p12)
}
  0x2c   : > { %975 = dma.hbm_to_vmem [thread:$0]  (!%p1246_p0), %s1240_s30, 1024, %s1242_s4, %s129_s6  }
  0x2d   : > { %p1409_p1 = scmp.lt.s32.totalorder %s1151_s14, 3  ;;  %p1410_p2 = scmp.ge.s32.totalorder %s1151_s14, 1 }
  0x2f   : > { %p148_p5 = pnand %p1410_p2, %p1409_p1 }
  0x30   : > { %s1282_s28 = sand.u32 (!%p148_p5), 1, %s1135_s10  }
  0x31   : > { %151 = sbr.rel (%p148_p5) target bundleno = 301 (0x12d), region = 28  ;;  %s935_s29 = sshll.u32 (!%p148_p5), %s1282_s28, 6 }
  0x32   : > { %s154_s3 = scalar_lea.sflag (!%p148_p5), [#allocation3], %s1282_s28  ;;  %s1286_s7 = scalar_lea.vmem (!%p148_p5), [#allocation2], %s935_s29 }
  0x38   : > { %1122 = dma.done.wait (%p1218_p8), %s154_s3, 1024  }
  0x39   : > { %1124 = vsyncadd (%p1218_p8), %s154_s3, 4294966272  ;;  %v1154_v0 = vmov 0.0   ;;  %v181_v1 = vld [vmem:[%s1286_s7] sm:$0xff]  ;;  %vm209_vm0 = vcmask 1043456   ;;  %v182_v2 = vld [vmem:[%s1286_s7 + $0x8] sm:$0xff]  ;;  %vm205_vm1 = vcmask 31744  }
  0x3a   : > { %306 = vmatprep.mubr.f32.mxu0 %v1154_v0  ;;  %377 = vmatprep.mubr.f32.mxu1 %v1154_v0  ;;  %v197_v3 = vcombine.high %v181_v1, %v181_v1  ;;  %v198_v4 = vcombine.high %v182_v2, %v182_v2  ;;  %v183_v5 = vld [vmem:[%s1286_s7 + $0x10] sm:$0xff]  ;;  %v184_v6 = vld [vmem:[%s1286_s7 + $0x18] sm:$0xff]  ;;  %v180_v7 = vld [vmem:[%s1401_s1] sm:$0xff]  ;;  %s936_s21 = sshll.u32 %s1282_s28, 7  ;;  %s967_s6 = sshll.u32 %s1143_s12, 11 }
  0x3b   : > { %v199_v8 = vcombine.high %v183_v5, %v183_v5  ;;  %v200_v9 = vcombine.high %v184_v6, %v184_v6  ;;  %v185_v10 = vld [vmem:[%s1286_s7 + $0x20] sm:$0xff]  ;;  %v186_v11 = vld [vmem:[%s1286_s7 + $0x28] sm:$0xff]  ;;  %v187_v14 = vld [vmem:[%s1286_s7 + $0x30] sm:$0xff]  ;;  %s1328_s5 = scalar_lea.vmem [#allocation5], %s936_s21  ;;  %s1347_s18 = scalar_lea.hbm %s1402_s2, %s967_s6 }
  0x3c   : > { %937 = vmatprep.subr.msk.mxu0 %vm209_vm0, %v197_v3  ;;  %940 = vmatprep.subr.msk.mxu1 %vm209_vm0, %v198_v4  ;;  %v201_v12 = vcombine.high %v185_v10, %v185_v10  ;;  %v202_v13 = vcombine.high %v186_v11, %v186_v11  ;;  %v188_v15 = vld [vmem:[%s1286_s7 + $0x38] sm:$0xff]  ;;  %v203_v16 = vcombine.high %v187_v14, %v187_v14  ;;  %s843_s8 = sshll.u32 %s1328_s5, 4  ;;  %s827_s12 = scalar_lea.sflag [#allocation4], %s1282_s28  ;;  %s1349_s8 = int_to_ptr.vmem [resolvable:$true] %s843_s8 }
  0x3d   : > { %938 = vmatpush1.msk.msra.mxu0 %vm209_vm0, %v181_v1  ;;  %941 = vmatpush1.msk.msra.mxu1 %vm209_vm0, %v182_v2  ;;  %v204_v17 = vcombine.high %v188_v15, %v188_v15  ;;  %s1069_s19 = scalar_lea.vmem %s1349_s8, 2048  ;;  %p1411_p9 = scmp.ne.s32.totalorder %s1406_s22, 0 }
  0x3e   : > { %939 = vmatmul.mubr.msk.f32.vlgmr.msra.gmra.mrb[0].mxu0 %vm205_vm1, %v180_v7  ;;  %942 = vmatmul.mubr.msk.f32.vlgmr.msra.gmra.mrb[0].mxu1 %vm205_vm1, %v180_v7  ;;  %p1070_p8 = scmp.ne.s32.totalorder %s1349_s8, %s1069_s19  ;;  %s1155_s20 = smov [#allocation5]  }
  0x3f   : > { %943 = vmatprep.subr.msk.mxu0 %vm209_vm0, %v199_v8  ;;  %946 = vmatprep.subr.msk.mxu1 %vm209_vm0, %v200_v9  ;;  %s1073_s25 = sshll.u32 %s1155_s20, 4  ;;  %s1074_s25 = int_to_ptr.vmem [resolvable:$false] %s1073_s25 }
  0x40   : > { %944 = vmatpush1.msk.msra.mxu0 %vm209_vm0, %v183_v5  ;;  %947 = vmatpush1.msk.msra.mxu1 %vm209_vm0, %v184_v6  ;;  %p1071_p11 = pnand %p1070_p8, %p1411_p9  ;;  %s1075_s26 = scalar_lea.vmem %s1074_s25, 4096 }
  0x41   : > { %448 = vmatprep.mubr.f32.mxu0 %v1154_v0  ;;  %519 = vmatprep.mubr.f32.mxu1 %v1154_v0  ;;  %p1076_p7 = scmp.lt.s32.totalorder %s1349_s8, %s1074_s25  ;;  %p1077_p13 = scmp.lt.s32.totalorder %s1075_s26, %s1069_s19 }
  0x42   : > { %945 = vmatmul.mubr.msk.f32.vlgmr.msra.gmra.mrb[2].mxu0 %vm205_vm1, %v180_v7  ;;  %948 = vmatmul.mubr.msk.f32.vlgmr.msra.gmra.mrb[2].mxu1 %vm205_vm1, %v180_v7  ;;  %p1072_p0 = pneg %p1071_p11 }
  0x43   : > { %949 = vmatprep.subr.msk.mxu0 %vm209_vm0, %v201_v12  ;;  %952 = vmatprep.subr.msk.mxu1 %vm209_vm0, %v202_v13  ;;  %p1078_p3 = por %p1077_p13, %p1076_p7 }
  0x44   : > { %950 = vmatpush1.msk.msra.mxu0 %vm209_vm0, %v185_v10  ;;  %953 = vmatpush1.msk.msra.mxu1 %vm209_vm0, %v186_v11 }
  0x45   : > { %590 = vmatprep.mubr.f32.mxu0 %v1154_v0  ;;  %661 = vmatprep.mubr.f32.mxu1 %v1154_v0  ;;  %p1079_p6 = pnand %p1078_p3, %p1072_p0 }
  0x46   : > { %951 = vmatmul.mubr.msk.f32.vlgmr.msra.gmra.mrb[4].mxu0 %vm205_vm1, %v180_v7  ;;  %954 = vmatmul.mubr.msk.f32.vlgmr.msra.gmra.mrb[4].mxu1 %vm205_vm1, %v180_v7 }
  0x47   : > { %955 = vmatprep.subr.msk.mxu0 %vm209_vm0, %v203_v16  ;;  %958 = vmatprep.subr.msk.mxu1 %vm209_vm0, %v204_v17 }
  0x48   : > { %956 = vmatpush1.msk.msra.mxu0 %vm209_vm0, %v187_v14  ;;  %959 = vmatpush1.msk.msra.mxu1 %vm209_vm0, %v188_v15 }
  0x49   : > { %732 = vmatprep.mubr.f32.mxu0 %v1154_v0  ;;  %803 = vmatprep.mubr.f32.mxu1 %v1154_v0 }
  0x4a   : > { %957 = vmatmul.mubr.msk.f32.vlgmr.msra.gmra.mrb[6].mxu0 %vm205_vm1, %v180_v7  ;;  %960 = vmatmul.mubr.msk.f32.vlgmr.msra.gmra.mrb[6].mxu1 %vm205_vm1, %v180_v7 }
 0x111   : > { %v308_v18 = vpop.f32.mrb[0].mxu0  ;;  %v379_v19 = vpop.f32.mrb[0].mxu1 }
 0x112   : > { %810 = vst [vmem:[%s1328_s5] sm:$0xff] %v308_v18  ;;  %812 = vst [vmem:[%s1328_s5 + $0x10] sm:$0xff] %v379_v19  ;;  %v310_v20 = vpop.f32.mrb[1].mxu0  ;;  %v381_v21 = vpop.f32.mrb[1].mxu1 }
 0x113   : > { %811 = vst [vmem:[%s1328_s5 + $0x8] sm:$0xff] %v310_v20  ;;  %813 = vst [vmem:[%s1328_s5 + $0x18] sm:$0xff] %v381_v21 }
 0x115   : > { %v450_v22 = vpop.f32.mrb[2].mxu0  ;;  %v521_v23 = vpop.f32.mrb[2].mxu1 }
 0x116   : > { %814 = vst [vmem:[%s1328_s5 + $0x20] sm:$0xff] %v450_v22  ;;  %816 = vst [vmem:[%s1328_s5 + $0x30] sm:$0xff] %v521_v23  ;;  %v452_v24 = vpop.f32.mrb[3].mxu0  ;;  %v523_v25 = vpop.f32.mrb[3].mxu1 }
 0x117   : > { %815 = vst [vmem:[%s1328_s5 + $0x28] sm:$0xff] %v452_v24  ;;  %817 = vst [vmem:[%s1328_s5 + $0x38] sm:$0xff] %v523_v25 }
 0x119   : > { %v592_v26 = vpop.f32.mrb[4].mxu0  ;;  %v663_v27 = vpop.f32.mrb[4].mxu1 }
 0x11a   : > { %818 = vst [vmem:[%s1328_s5 + $0x40] sm:$0xff] %v592_v26  ;;  %820 = vst [vmem:[%s1328_s5 + $0x50] sm:$0xff] %v663_v27  ;;  %v594_v28 = vpop.f32.mrb[5].mxu0  ;;  %v665_v29 = vpop.f32.mrb[5].mxu1 }
 0x11b   : > { %819 = vst [vmem:[%s1328_s5 + $0x48] sm:$0xff] %v594_v28  ;;  %821 = vst [vmem:[%s1328_s5 + $0x58] sm:$0xff] %v665_v29 }
 0x11d   : > { %v734_v30 = vpop.f32.mrb[6].mxu0  ;;  %v805_v31 = vpop.f32.mrb[6].mxu1 }
 0x11e   : > { %822 = vst [vmem:[%s1328_s5 + $0x60] sm:$0xff] %v734_v30  ;;  %824 = vst [vmem:[%s1328_s5 + $0x70] sm:$0xff] %v805_v31  ;;  %v736_v32 = vpop.f32.mrb[7].mxu0  ;;  %v807_v33 = vpop.f32.mrb[7].mxu1 }
 0x11f   : > { %823 = vst [vmem:[%s1328_s5 + $0x68] sm:$0xff] %v736_v32  ;;  %825 = vst [vmem:[%s1328_s5 + $0x78] sm:$0xff] %v807_v33 }
 0x120   : > { %1082 = shalt.err (!%p1079_p6)
}
 0x121   : > { %s1083_s27 = scalar_lea.hbm %s1347_s18, 2048  ;;  %s1087_s3 = scalar_lea.hbm %s1402_s2, 4096 }
 0x122   : > { %p1084_p4 = scmp.ne.s32.totalorder %s1347_s18, %s1083_s27  ;;  %p1088_p1 = scmp.lt.u32.totalorder %s1347_s18, %s1402_s2 }
 0x123   : > { %p1089_p2 = scmp.lt.u32.totalorder %s1087_s3, %s1083_s27  ;;  %p1091_p8 = scmp.lt.u32.totalorder %s1083_s27, %s1347_s18 }
 0x124   : > { %p1085_p10 = pnand %p1084_p4, %p1411_p9 }
 0x125   : > { %p1090_p5 = por %p1089_p2, %p1088_p1 }
 0x126   : > { %p1086_p12 = pneg %p1085_p10 }
 0x127   : > { %p1092_p11 = por %p1091_p8, %p1090_p5 }
 0x129   : > { %p1093_p0 = pnand %p1092_p11, %p1086_p12 }
 0x12b   : > { %1096 = shalt.err (!%p1093_p0)
}
 0x12c   : > { %970 = dma.vmem_to_hbm [thread:$0]  (%p1411_p9), %s1349_s8, 2048, %s1347_s18, %s827_s12  }
 0x12d PF: > { %s855_s4 = sand.u32 1, %s1131_s9   ;;  %p1412_p7 = scmp.ne.s32.totalorder %s1407_s24, 0 }
 0x12e   : > { %p1413_p13 = scmp.ge.s32.totalorder %s1151_s14, 2  ;;  %s856_s21 = scalar_lea.sflag [#allocation4], %s855_s4 }
 0x130   : > { %p977_p3 = pnand %p1413_p13, %p1412_p7 }
 0x132   : > { %1126 = dma.done.wait (!%p977_p3), %s856_s21, 2048  }
 0x133   : > { %1128 = vsyncadd (!%p977_p3), %s856_s21, 4294965248  ;;  %s18_s14 = sadd.s32 1, %s1151_s14   ;;  %s1414_s9 = smov %s1135_s10 }
 0x134   : > { %p15_p6 = scmp.ge.s32.totalorder %s18_s14, 4   ;;  %s1415_s10 = smov %s1139_s11 }
 0x135   : > { %s1416_s11 = smov %s1227_s23  ;;  %s1417_s12 = smov %s1147_s13 }
 0x136   : > { %s1418_s13 = smov %s1420_s17  ;;  %17 = sbr.rel (!%p15_p6) target bundleno = 6 (0x6), region = 73 }
 0x13d   :  { %861 = vsyncpa [#allocation3], 1 }
 0x13e   :  { %863 = vsyncpa [#allocation3 + $0x1], 1 }
 0x13f   :  { %864 = vsyncpa [#allocation4], 1 }
 0x140   :  { %866 = vsyncpa [#allocation4 + $0x1], 1 }

</bundles_post_ra>
